<compile_context>
chip_gen: v6e
topology: v6e:2x2x1
jax: 0.10.0
libtpu: 0.0.40
codegen_flags: <defaults>
</compile_context>

<pallas_src>
import functools

import jax
import jax.numpy as jnp
from jax.experimental import pallas as pl
from jax.experimental.pallas import tpu as pltpu


def _dropblock_mul_kernel(scale_ref, x_ref, keep_ref, out_ref):
    """Elementwise: out = x * keep_mask * scale.

    scale_ref : (1,1) f32 in SMEM (global torchvision normalization, precomputed)
    x_ref     : (nc_tile, HW) input tile
    keep_ref  : (nc_tile, HW) int8 {0,1} keep-mask tile (already max-pooled)
    out_ref   : (nc_tile, HW) output tile, x.dtype
    Compute is done in f32 (v5e has no bf16 VPU); single rounding to out dtype.
    """
    scale = scale_ref[0, 0]
    keep = keep_ref[...].astype(jnp.float32)
    out_ref[...] = (x_ref[...].astype(jnp.float32) * keep * scale).astype(out_ref.dtype)


def _bernoulli_noise(key, gamma, shape):
    # TODO(synk): torch's bernoulli_ RNG stream cannot be reproduced bit-exactly;
    # a deterministic jax.random draw is used instead.
    return jax.random.bernoulli(key, gamma, shape)


def _clamp_block_size(block_size, H, W):
    # TODO(synk): even block_size is clamped to the next lower odd value
    # (torchvision's even-block path produces mismatched pooled shapes anyway).
    bs = min(block_size, H, W)
    if bs % 2 == 0:
        bs -= 1
    return max(bs, 1)


def _rup(v, m):
    return -(-v // m) * m


def _rdn(v, m):
    return (v // m) * m


def drop_block2d(x, *, p=0.1, block_size=3, eps=1e-6, key=None, training=True):
    """Pallas TPU implementation of torchvision.ops.DropBlock2d forward."""
    if not training or p == 0.0:
        return x

    N, C, H, W = x.shape
    NC, HW = N * C, H * W

    bs = _clamp_block_size(block_size, H, W)
    pad = bs // 2
    hn, wn = H - bs + 1, W - bs + 1
    gamma = (p * H * W) / ((bs * bs) * (hn * wn))

    if key is None:
        key = jax.random.PRNGKey(0)

    # ---- cheap XLA pre-pass on the small int8 noise (same element count as x,
    #      but 1 byte/elem): pad + max-pool + keep-mask + count + scale ----------
    noise = _bernoulli_noise(key, gamma, (NC, hn, wn)).astype(jnp.int8)
    # F.pad(bs//2) + max_pool2d's own bs//2 zero padding baked in: (bs-1) per side.
    pooled = jax.lax.reduce_window(
        noise, jnp.int8(0), jax.lax.max,
        window_dimensions=(1, bs, bs), window_strides=(1, 1, 1),
        padding=[(0, 0), (2 * pad, 2 * pad), (2 * pad, 2 * pad)])      # (NC, H, W)
    keep = (1 - pooled).astype(jnp.int8).reshape(NC, HW)               # {0,1}
    kept = jnp.sum(keep.astype(jnp.int32)).astype(jnp.float32)         # exact count
    scale = (jnp.float32(NC * HW) / (eps + kept)).reshape(1, 1)        # SMEM scalar

    x2 = x.reshape(NC, HW)                                             # free reshape

    # ---- NC tile sizing from PADDED VMEM bytes (lane axis = HW, full block) ----
    SUB = 32                                  # int8 native sublane tile; multiple of 8
    HW_pad = _rup(HW, 128)
    bytes_per_row = HW_pad * (4 + 4 + 1)      # f32 x + f32 out + int8 keep, lane-padded
    target_tile_bytes = 6 << 20               # ~6 MiB logical per grid step
    nc_cap = max(SUB, _rdn(target_tile_bytes // bytes_per_row, SUB))

    if NC <= SUB or nc_cap >= NC:
        if NC >= 2 * SUB and NC % SUB == 0:
            nc_tile = _rdn(NC // 2, SUB)      # two halves -> v7x's 2 TensorCores busy
        else:
            nc_tile = NC                      # single full block (== full dim is legal)
    else:
        nc_tile = min(nc_cap, max(SUB, _rdn(NC // 2, SUB)))
    num_tiles = pl.cdiv(NC, nc_tile)
    if num_tiles > 2 and num_tiles % 2 == 1 and nc_tile > SUB:
        cand = nc_tile - SUB                  # prefer an even grid (v7x megacore)
        if pl.cdiv(NC, cand) % 2 == 0:
            nc_tile, num_tiles = cand, pl.cdiv(NC, cand)

    # double-buffered (x + out + keep) padded tiles, with headroom, inside v7x 64 MiB
    tile_rows = min(_rup(nc_tile, SUB), _rup(NC, SUB))
    tile_vmem = tile_rows * HW_pad * (4 + 4 + 1)
    vmem_limit = int(min(max(4 * tile_vmem + (1 << 20), 16 << 20), 48 << 20))

    out2 = pl.pallas_call(
        _dropblock_mul_kernel,
        out_shape=jax.ShapeDtypeStruct((NC, HW), x.dtype),
        grid=(num_tiles,),
        in_specs=[
            pl.BlockSpec((1, 1), lambda i: (0, 0),
                         memory_space=pltpu.MemorySpace.SMEM),          # scale
            pl.BlockSpec((nc_tile, HW), lambda i: (i, 0)),              # x
            pl.BlockSpec((nc_tile, HW), lambda i: (i, 0)),              # keep (int8)
        ],
        out_specs=pl.BlockSpec((nc_tile, HW), lambda i: (i, 0)),
        compiler_params=pltpu.CompilerParams(
            dimension_semantics=("parallel",),
            vmem_limit_bytes=vmem_limit,
        ),
    )(scale, x2, keep)

    return out2.reshape(N, C, H, W)


def drop_block2d_reference(x, *, p=0.1, block_size=3, eps=1e-6, key=None):
    """Pure-JAX (XLA) reference with the same noise draw, for validation."""
    N, C, H, W = x.shape
    bs = _clamp_block_size(block_size, H, W)
    pad = bs // 2
    hn, wn = H - bs + 1, W - bs + 1
    gamma = (p * H * W) / ((bs * bs) * (hn * wn))
    noise = _bernoulli_noise(key, gamma, (N * C, hn, wn)).astype(jnp.float32)
    noise = jnp.pad(noise, ((0, 0), (pad, pad), (pad, pad)))            # F.pad step
    pooled = jax.lax.reduce_window(
        noise, 0.0, jax.lax.max, (1, bs, bs), (1, 1, 1),
        [(0, 0), (pad, pad), (pad, pad)])
    mask = 1.0 - pooled
    scale = mask.size / (eps + mask.sum())
    out = x.reshape(N * C, H, W).astype(jnp.float32) * mask * scale
    return out.reshape(N, C, H, W).astype(x.dtype)


class DropBlockWrapper:
    """Mirrors the PyTorch DropBlockWrapper: forwards the input to the wrapped layer."""

    def __init__(self, layer):
        self.layer = layer
        self.n_inputs = 1

    def __call__(self, a):
        # TODO(synk): reference forward returns None; we return the result so it can
        # be blocked on / checked.
        return self.layer(a)


if __name__ == "__main__":
    key = jax.random.PRNGKey(0)
    kx, kn = jax.random.split(key)
    x = jax.random.normal(kx, (2, 4, 16, 16), dtype=jnp.float32)

    layer = functools.partial(drop_block2d, p=0.1, block_size=3, key=kn,
                              training=True)
    wrapper = DropBlockWrapper(layer)

    y = wrapper(x)
    y = jax.block_until_ready(y)

    assert y.shape == x.shape and y.dtype == x.dtype
    assert bool(jnp.all(jnp.isfinite(y)))

    y_ref = drop_block2d_reference(x, p=0.1, block_size=3, key=kn)
    assert bool(jnp.allclose(y, y_ref, atol=1e-5, rtol=1e-5))

    print("KERNEL_OK")
</pallas_src>

<mosaic_0001>
module attributes {stable_mosaic.version = 11 : i64} {
  func.func @_dropblock_mul_kernel(%arg0: i32, %arg1: memref<1x1xf32, #tpu.memory_space<smem>>, %arg2: memref<8x256xf32, #tpu.memory_space<vmem>>, %arg3: memref<8x256xi8, #tpu.memory_space<vmem>>, %arg4: memref<8x256xf32, #tpu.memory_space<vmem>>) attributes {dimension_semantics = [#tpu.dimension_semantics<parallel>], iteration_bounds = array<i64: 1>, scalar_prefetch = 0 : i64, scratch_operands = 0 : i64, tpu.core_type = #tpu.core_type<tc>, window_params = [{transform_indices = @transform_0, window_bounds = array<i64: 1, 1>}, {transform_indices = @transform_1, window_bounds = array<i64: 8, 256>}, {transform_indices = @transform_2, window_bounds = array<i64: 8, 256>}, {transform_indices = @transform_3, window_bounds = array<i64: 8, 256>}]} {
    %c0 = arith.constant 0 : index
    %c0_0 = arith.constant 0 : index
    %0 = memref.load %arg1[%c0, %c0_0] : memref<1x1xf32, #tpu.memory_space<smem>>
    %c0_1 = arith.constant 0 : index
    %c0_2 = arith.constant 0 : index
    %1 = vector.load %arg3[%c0_1, %c0_2] : memref<8x256xi8, #tpu.memory_space<vmem>>, vector<8x256xi8>
    %2 = arith.sitofp %1 : vector<8x256xi8> to vector<8x256xf32>
    %c0_3 = arith.constant 0 : index
    %c0_4 = arith.constant 0 : index
    %3 = vector.load %arg2[%c0_3, %c0_4] : memref<8x256xf32, #tpu.memory_space<vmem>>, vector<8x256xf32>
    %4 = arith.mulf %3, %2 : vector<8x256xf32>
    %5 = vector.broadcast %0 : f32 to vector<8x256xf32>
    %6 = arith.mulf %4, %5 : vector<8x256xf32>
    %c0_5 = arith.constant 0 : index
    %c0_6 = arith.constant 0 : index
    %7 = vector.load %arg4[%c0_5, %c0_6] : memref<8x256xf32, #tpu.memory_space<vmem>>, vector<8x256xf32>
    tpu.vector_store %arg4[%c0_5, %c0_6], %6 {strides = array<i32>} : memref<8x256xf32, #tpu.memory_space<vmem>>, vector<8x256xf32>,
    return
  }
  func.func @transform_0(%arg0: i32) -> (i32, i32) {
    %c0_i32 = arith.constant 0 : i32
    %c0_i32_0 = arith.constant 0 : i32
    %c0_i32_1 = arith.constant 0 : i32
    return %c0_i32, %c0_i32_0 : i32, i32
  }
  func.func @transform_1(%arg0: i32) -> (i32, i32) {
    %c0_i32 = arith.constant 0 : i32
    %c0_i32_0 = arith.constant 0 : i32
    return %arg0, %c0_i32 : i32, i32
  }
  func.func @transform_2(%arg0: i32) -> (i32, i32) {
    %c0_i32 = arith.constant 0 : i32
    %c0_i32_0 = arith.constant 0 : i32
    return %arg0, %c0_i32 : i32, i32
  }
  func.func @transform_3(%arg0: i32) -> (i32, i32) {
    %c0_i32 = arith.constant 0 : i32
    %c0_i32_0 = arith.constant 0 : i32
    return %arg0, %c0_i32 : i32, i32
  }
}

</mosaic_0001>

<bundles_post_ra>
// kernel: tpu_custom_call.1
= control target key start
LH: loop header
LB: loop body
LE: loop exit
PB: predicated region body
PF: predicated region fallthrough
CT: control target
= control target key end

     0   :  { %9 = vsyncpa [#allocation4], 0  ;;  %s175_s0 = inlined_call_operand.<no memory space> [shape: f32[1,1], index: 0, kind: input, shape index: {}]   ;;  %s176_s1 = inlined_call_operand.hbm [shape: f32[8,256], index: 1, kind: input, shape index: {}]   ;;  %s177_s2 = inlined_call_operand.hbm [shape: s8[8,256], index: 2, kind: input, shape index: {}]   ;;  %s178_s3 = inlined_call_operand.hbm [shape: f32[8,256], index: 3, kind: output, shape index: {}]  }
   0x1   :  { %10 = vsyncpa [#allocation7], 0 }
   0x2   :  { %11 = vsyncpa [#allocation5], 0  ;;  %s140_s12 = smov [#allocation3]   ;;  %s141_s14 = smov [#allocation6]  }
   0x3   :  { %s20_s13 = sshll.u32 %s140_s12, 4  ;;  %s30_s15 = sshll.u32 %s141_s14, 4  ;;  %s21_s13 = int_to_ptr.vmem [resolvable:$true] %s20_s13  ;;  %s31_s15 = int_to_ptr.vmem [resolvable:$true] %s30_s15 }
   0x4   :  { %s82_s16 = scalar_lea.vmem %s21_s13, 256  ;;  %p87_p1 = scmp.lt.s32.totalorder %s21_s13, %s21_s13 }
   0x5   :  { %p83_p0 = scmp.ne.s32.totalorder %s21_s13, %s82_s16  ;;  %p88_p2 = scmp.lt.s32.totalorder %s82_s16, %s82_s16 }
   0x7   :  { %p89_p3 = por %p88_p2, %p87_p1 }
   0x9   :  { %p90_p4 = pnand %p89_p3, %p83_p0 }
   0xb   :  { %93 = shalt.err (!%p90_p4)
}
   0xc   :  { %23 = dma.hbm_to_vmem [thread:$0]  %s176_s1, 256, %s21_s13, [#allocation4]  }
   0xd   :  { %s102_s19 = scalar_lea.vmem %s31_s15, 64  ;;  %p107_p6 = scmp.lt.s32.totalorder %s31_s15, %s31_s15 }
   0xe   :  { %p103_p5 = scmp.ne.s32.totalorder %s31_s15, %s102_s19  ;;  %p108_p7 = scmp.lt.s32.totalorder %s102_s19, %s102_s19 }
  0x10   :  { %p109_p8 = por %p108_p7, %p107_p6 }
  0x12   :  { %p110_p9 = pnand %p109_p8, %p103_p5 }
  0x14   :  { %113 = shalt.err (!%p110_p9)
}
  0x15   :  { %33 = dma.hbm_to_vmem [thread:$0]  %s177_s2, 64, %s31_s15, [#allocation7]  }
  0x16   :  { %134 = dma.done.wait [#allocation4], 256  }
  0x17   :  { %135 = vsyncadd [#allocation4], 4294967040 }
  0x18   :  { %136 = dma.done.wait [#allocation7], 64  }
  0x19   :  { %137 = vsyncadd [#allocation7], 4294967232  ;;  %v41_v0 = vld [vmem:[#allocation6] sm:$0xf]  ;;  %v46_v3 = vld [vmem:[#allocation3] sm:$0xff]  ;;  %v50_v7 = vstv %s175_s0  ;;  %s142_s23 = smov [#allocation8]  }
  0x1a   :  { %v42_v1 = vunpack.c.0.s8 %v41_v0  ;;  %v43_v2 = vunpack.c.1.s8 %v41_v0  ;;  %v47_v4 = vld [vmem:[#allocation3 + $0x8] sm:$0xff]  ;;  %s61_s24 = sshll.u32 %s142_s23, 4  ;;  %s62_s24 = int_to_ptr.vmem [resolvable:$true] %s61_s24 }
  0x1b   :  { %s114_s2 = scalar_lea.vmem %s62_s24, 256  ;;  %p119_p11 = scmp.lt.s32.totalorder %s62_s24, %s62_s24 }
  0x1c   :  { %v44_v5 = vcvt.s32.f32 %v42_v1  ;;  %v45_v6 = vcvt.s32.f32 %v43_v2  ;;  %p115_p10 = scmp.ne.s32.totalorder %s62_s24, %s114_s2  ;;  %p120_p12 = scmp.lt.s32.totalorder %s114_s2, %s114_s2 }
  0x1e   :  { %v48_v8 = vmul.f32 %v46_v3, %v44_v5  ;;  %v49_v9 = vmul.f32 %v47_v4, %v45_v6  ;;  %p121_p13 = por %p120_p12, %p119_p11 }
  0x20   :  { %v51_v10 = vmul.f32 %v50_v7, %v48_v8  ;;  %v52_v11 = vmul.f32 %v50_v7, %v49_v9  ;;  %p122_p0 = pnand %p121_p13, %p115_p10 }
  0x22   :  { %53 = vst [vmem:[#allocation8] sm:$0xff] %v51_v10  ;;  %54 = vst [vmem:[#allocation8 + $0x8] sm:$0xff] %v52_v11 }
  0x23   :  { %125 = shalt.err (!%p122_p0)
}
  0x24   :  { %64 = dma.vmem_to_hbm [thread:$0]  %s62_s24, 256, %s178_s3, [#allocation5]  }
  0x25   :  { %138 = dma.done.wait [#allocation5], 256  }
  0x26   :  { %139 = vsyncadd [#allocation5], 4294967040 }
  0x27   :  { %68 = vsyncpa [#allocation4], 1 }
  0x28   :  { %69 = vsyncpa [#allocation7], 1 }
  0x29   :  { %70 = vsyncpa [#allocation5], 1 }

</bundles_post_ra>
